<compile_context>
chip_gen: v5e
topology: v5e:2x2
jax: 0.10.0
libtpu: 0.0.40
codegen_flags: <defaults>
</compile_context>

<pallas_src>
import functools

import jax
import jax.numpy as jnp
from jax.experimental import pallas as pl
from jax.experimental.pallas import tpu as pltpu

LANE = 128


# ------------------------------ small helpers -------------------------------


def _round_up(x, m):
    return ((x + m - 1) // m) * m


def _pick_tile(padded_dim, pref):
    """Largest power-of-two multiple of 128 <= pref dividing padded_dim (a 128-multiple)."""
    t = pref
    while padded_dim % t:
        t //= 2
    return t


def _pad2(x, rows, cols, dtype=None):
    out = jnp.pad(x, ((0, rows - x.shape[0]), (0, cols - x.shape[1])))
    return out.astype(dtype) if dtype is not None else out


# ----------------------------- Pallas kernels --------------------------------
#
# Fused SAGEConv: grid = (row tiles, K tiles).  K (source-node) axis is the
# reduction; the f32 accumulator holds the mean-aggregated source features for
# the current row tile, and the epilogue fires once on the last K step.


def _fused_sage_kernel(adj_ref, xs_ref, xd_ref, wl_ref, bl_ref, wr_ref,
                       o_ref, acc_ref, *, relu):
    @pl.when(pl.program_id(1) == 0)
    def _init():
        acc_ref[...] = jnp.zeros_like(acc_ref)

    acc_ref[...] += jnp.dot(adj_ref[...], xs_ref[...],
                            preferred_element_type=jnp.float32)

    @pl.when(pl.program_id(1) == pl.num_programs(1) - 1)
    def _epilogue():
        agg = acc_ref[...].astype(wl_ref.dtype)
        h = (jnp.dot(agg, wl_ref[...], preferred_element_type=jnp.float32)
             + jnp.dot(xd_ref[...], wr_ref[...], preferred_element_type=jnp.float32)
             + bl_ref[...])
        if relu:
            h = jnp.maximum(h, 0.0)
        o_ref[...] = h


def _fused_sage_head_kernel(adj_ref, xs_ref, xd_ref, wl_ref, bl_ref, wr_ref,
                            wh_ref, bh_ref, o_ref, acc_ref):
    @pl.when(pl.program_id(1) == 0)
    def _init():
        acc_ref[...] = jnp.zeros_like(acc_ref)

    acc_ref[...] += jnp.dot(adj_ref[...], xs_ref[...],
                            preferred_element_type=jnp.float32)

    @pl.when(pl.program_id(1) == pl.num_programs(1) - 1)
    def _epilogue():
        agg = acc_ref[...].astype(wl_ref.dtype)
        h = (jnp.dot(agg, wl_ref[...], preferred_element_type=jnp.float32)
             + jnp.dot(xd_ref[...], wr_ref[...], preferred_element_type=jnp.float32)
             + bl_ref[...])
        h = jnp.maximum(h, 0.0)                      # SAGEConv(...).relu()
        o_ref[...] = (jnp.dot(h.astype(wh_ref.dtype), wh_ref[...],
                              preferred_element_type=jnp.float32) + bh_ref[...])


def _fused_sage_dual_kernel(adj_ref, xs_ref, xd_ref,
                            wl1_ref, bl1_ref, wr1_ref,
                            wl2_ref, bl2_ref, wr2_ref,
                            o1_ref, o2_ref, acc_ref):
    @pl.when(pl.program_id(1) == 0)
    def _init():
        acc_ref[...] = jnp.zeros_like(acc_ref)

    acc_ref[...] += jnp.dot(adj_ref[...], xs_ref[...],
                            preferred_element_type=jnp.float32)

    @pl.when(pl.program_id(1) == pl.num_programs(1) - 1)
    def _epilogue():
        agg = acc_ref[...].astype(wl1_ref.dtype)
        xd_f32_l = jnp.dot(xd_ref[...], wr1_ref[...],
                           preferred_element_type=jnp.float32)
        xd_f32_r = jnp.dot(xd_ref[...], wr2_ref[...],
                           preferred_element_type=jnp.float32)
        h1 = (jnp.dot(agg, wl1_ref[...], preferred_element_type=jnp.float32)
              + xd_f32_l + bl1_ref[...])
        h2 = (jnp.dot(agg, wl2_ref[...], preferred_element_type=jnp.float32)
              + xd_f32_r + bl2_ref[...])
        o1_ref[...] = jnp.maximum(h1, 0.0)
        o2_ref[...] = jnp.maximum(h2, 0.0)


def fused_sage_conv(adj, x_src, x_dst, wl, bl, wr, *, relu=True, head=None,
                    tm_pref=256, tk_pref=512):
    """relu(mean_aggr(adj, x_src) @ wl + bl + x_dst @ wr) [optionally + Linear head],
    computed in a single pass over the adjacency.  All dims pre-padded to 128
    multiples; adjacency / features bf16, accumulation f32."""
    M, K = adj.shape
    _, F = x_src.shape
    _, F2 = x_dst.shape
    H = wl.shape[1]
    tm = _pick_tile(M, tm_pref)
    tk = _pick_tile(K, tk_pref)
    grid = (M // tm, K // tk)

    base_specs = [
        pl.BlockSpec((tm, tk), lambda i, k: (i, k)),   # adj
        pl.BlockSpec((tk, F), lambda i, k: (k, 0)),    # x_src
        pl.BlockSpec((tm, F2), lambda i, k: (i, 0)),   # x_dst
        pl.BlockSpec((F, H), lambda i, k: (0, 0)),     # wl
        pl.BlockSpec((1, H), lambda i, k: (0, 0)),     # bl
        pl.BlockSpec((F2, H), lambda i, k: (0, 0)),    # wr
    ]

    if head is None:
        kernel = functools.partial(_fused_sage_kernel, relu=relu)
        operands = (adj, x_src, x_dst, wl, bl, wr)
        in_specs = base_specs
        out_dim = H
        flops = 2 * M * K * F + 2 * M * H * (F + F2)
    else:
        wh, bh = head
        O = wh.shape[1]
        kernel = _fused_sage_head_kernel
        operands = (adj, x_src, x_dst, wl, bl, wr, wh, bh)
        in_specs = base_specs + [pl.BlockSpec((H, O), lambda i, k: (0, 0)),
                                 pl.BlockSpec((1, O), lambda i, k: (0, 0))]
        out_dim = O
        flops = 2 * M * K * F + 2 * M * (H * (F + F2) + H * O)

    nbytes = (sum(int(op.size) * op.dtype.itemsize for op in operands)
              + M * out_dim * 4)
    return pl.pallas_call(
        kernel,
        out_shape=jax.ShapeDtypeStruct((M, out_dim), jnp.float32),
        grid_spec=pltpu.PrefetchScalarGridSpec(
            num_scalar_prefetch=0,
            grid=grid,
            in_specs=in_specs,
            out_specs=pl.BlockSpec((tm, out_dim), lambda i, k: (i, 0)),
            scratch_shapes=[pltpu.VMEM((tm, F), jnp.float32)]),
        compiler_params=pltpu.CompilerParams(
            dimension_semantics=("parallel", "arbitrary")),
        cost_estimate=pl.CostEstimate(flops=flops, transcendentals=0,
                                      bytes_accessed=nbytes),
    )(*operands)


def fused_sage_conv_dual(adj, x_src, x_dst, conv_a, conv_b, *,
                         tm_pref=256, tk_pref=512):
    """Two SAGEConvs sharing the same (adj, x_src, x_dst): the aggregation is
    accumulated once, both epilogues are applied on the last K step."""
    M, K = adj.shape
    _, F = x_src.shape
    _, F2 = x_dst.shape
    wl1, bl1, wr1 = conv_a
    wl2, bl2, wr2 = conv_b
    H = wl1.shape[1]
    tm = _pick_tile(M, tm_pref)
    tk = _pick_tile(K, tk_pref)
    grid = (M // tm, K // tk)

    operands = (adj, x_src, x_dst, wl1, bl1, wr1, wl2, bl2, wr2)
    in_specs = [
        pl.BlockSpec((tm, tk), lambda i, k: (i, k)),
        pl.BlockSpec((tk, F), lambda i, k: (k, 0)),
        pl.BlockSpec((tm, F2), lambda i, k: (i, 0)),
        pl.BlockSpec((F, H), lambda i, k: (0, 0)),
        pl.BlockSpec((1, H), lambda i, k: (0, 0)),
        pl.BlockSpec((F2, H), lambda i, k: (0, 0)),
        pl.BlockSpec((F, H), lambda i, k: (0, 0)),
        pl.BlockSpec((1, H), lambda i, k: (0, 0)),
        pl.BlockSpec((F2, H), lambda i, k: (0, 0)),
    ]
    flops = 2 * M * K * F + 2 * (2 * M * H * (F + F2))
    nbytes = (sum(int(op.size) * op.dtype.itemsize for op in operands)
              + 2 * M * H * 4)
    return pl.pallas_call(
        _fused_sage_dual_kernel,
        out_shape=(jax.ShapeDtypeStruct((M, H), jnp.float32),
                   jax.ShapeDtypeStruct((M, H), jnp.float32)),
        grid_spec=pltpu.PrefetchScalarGridSpec(
            num_scalar_prefetch=0,
            grid=grid,
            in_specs=in_specs,
            out_specs=[pl.BlockSpec((tm, H), lambda i, k: (i, 0)),
                       pl.BlockSpec((tm, H), lambda i, k: (i, 0))],
            scratch_shapes=[pltpu.VMEM((tm, F), jnp.float32)]),
        compiler_params=pltpu.CompilerParams(
            dimension_semantics=("parallel", "arbitrary")),
        cost_estimate=pl.CostEstimate(flops=flops, transcendentals=0,
                                      bytes_accessed=nbytes),
    )(*operands)


def _edge_decoder_kernel(zs_ref, zd_ref, w1s_ref, w1d_ref, b1_ref, w2_ref, b2_ref,
                         o_ref):
    # cat([z_src, z_dst], -1) @ W1 == z_src @ W1[:H] + z_dst @ W1[H:]
    h = (jnp.dot(zs_ref[...], w1s_ref[...], preferred_element_type=jnp.float32)
         + jnp.dot(zd_ref[...], w1d_ref[...], preferred_element_type=jnp.float32)
         + b1_ref[...])
    h = jnp.maximum(h, 0.0)
    o_ref[...] = (jnp.dot(h.astype(w2_ref.dtype), w2_ref[...],
                          preferred_element_type=jnp.float32) + b2_ref[...])


def edge_decoder(zs, zd, w1s, w1d, b1, w2, b2, *, te_pref=256):
    """Fused 2-layer edge MLP.  Output is a lane-dense (E,128) tile; the real
    (E,1) result lives in column 0 and is sliced by the caller."""
    E, O = zs.shape
    H = w1s.shape[1]
    W = w2.shape[1]
    te = _pick_tile(E, te_pref)
    grid = (E // te,)
    flops = 2 * E * (2 * O * H + H * W)
    nbytes = ((zs.size + zd.size) * zs.dtype.itemsize
              + (w1s.size + w1d.size + w2.size) * w1s.dtype.itemsize
              + (b1.size + b2.size) * 4 + E * W * 4)
    return pl.pallas_call(
        _edge_decoder_kernel,
        out_shape=jax.ShapeDtypeStruct((E, W), jnp.float32),
        grid_spec=pltpu.PrefetchScalarGridSpec(
            num_scalar_prefetch=0,
            grid=grid,
            in_specs=[pl.BlockSpec((te, O), lambda i: (i, 0)),
                      pl.BlockSpec((te, O), lambda i: (i, 0)),
                      pl.BlockSpec((O, H), lambda i: (0, 0)),
                      pl.BlockSpec((O, H), lambda i: (0, 0)),
                      pl.BlockSpec((1, H), lambda i: (0, 0)),
                      pl.BlockSpec((H, W), lambda i: (0, 0)),
                      pl.BlockSpec((1, W), lambda i: (0, 0))],
            out_specs=pl.BlockSpec((te, W), lambda i: (i, 0))),
        compiler_params=pltpu.CompilerParams(dimension_semantics=("parallel",)),
        cost_estimate=pl.CostEstimate(flops=flops, transcendentals=0,
                                      bytes_accessed=nbytes),
    )(zs, zd, w1s, w1d, b1, w2, b2)


# ------------------------------ JAX glue -------------------------------------


def build_mean_adj(edge_index, n_src, n_dst):
    """Row-normalized dense adjacency (n_dst, n_src): mean aggregation matrix.
    Zero in-degree nodes get an all-zero row (matches PyG scatter-mean)."""
    src, dst = edge_index[0], edge_index[1]
    a = jnp.zeros((n_dst, n_src), jnp.float32).at[dst, src].add(1.0)
    deg = a.sum(axis=1, keepdims=True)
    return a / jnp.maximum(deg, 1.0)


def init_params(key, num_customers, f_prod, hidden, out_ch):
    ks = iter(jax.random.split(key, 64))

    def dense(shape, scale=0.1):
        return scale * jax.random.normal(next(ks), shape, jnp.float32)

    def conv(f_src, f_dst, h):
        # (W_l, b_l, W_r): lin_l has bias, lin_r does not (PyG SAGEConv default)
        return (dense((f_src, h)), dense((1, h)), dense((f_dst, h)))

    return {
        "emb": dense((num_customers, hidden), 1.0),
        "user": {
            "conv1": conv(f_prod, f_prod, hidden),
            "conv2": conv(f_prod, hidden, hidden),
            "conv3": conv(hidden, hidden, hidden),
            "lin_w": dense((hidden, out_ch)),
            "lin_b": dense((1, out_ch)),
        },
        "item": {
            "conv1": conv(f_prod, f_prod, hidden),
            "conv2": conv(hidden, hidden, hidden),
            "lin_w": dense((hidden, out_ch)),
            "lin_b": dense((1, out_ch)),
        },
        "dec": {
            "w1s": dense((out_ch, out_ch)),   # first half of lin1 weight (z_src part)
            "w1d": dense((out_ch, out_ch)),   # second half of lin1 weight (z_dst part)
            "b1": dense((1, out_ch)),
            "w2": dense((out_ch, 1)),
            "b2": dense((1, 1)),
        },
    }


def meta_sage_forward(params, customer_ids, x_prod, ei_pp, ei_pc, edge_label_index,
                      n_cust, n_prod):
    bf16 = jnp.bfloat16
    f_prod = x_prod.shape[1]
    hidden = params["emb"].shape[1]
    out_ch = params["user"]["lin_w"].shape[1]

    # lane-dense padded dims (multiples of 128)
    np_p = _round_up(n_prod, LANE)
    nc_p = _round_up(n_cust, LANE)
    fp_p = _round_up(f_prod, LANE)
    h_p = _round_up(hidden, LANE)
    o_p = _round_up(out_ch, LANE)

    # glue: embedding lookup, dense mean-adjacency build, pad + bf16 cast
    x_cust = params["emb"][customer_ids]                    # (n_cust, hidden)
    adj_pp = build_mean_adj(ei_pp, n_prod, n_prod)          # product -> product
    adj_pc = build_mean_adj(ei_pc, n_prod, n_cust)          # product -> customer

    x_prod_p = _pad2(x_prod, np_p, fp_p, bf16)
    x_cust_p = _pad2(x_cust, nc_p, h_p, bf16)
    adj_pp_p = _pad2(adj_pp, np_p, np_p, bf16)
    adj_pc_p = _pad2(adj_pc, nc_p, np_p, bf16)

    def conv_w(c, f_src_p, f_dst_p):
        wl, bl, wr = c
        return (_pad2(wl, f_src_p, h_p, bf16), _pad2(bl, 1, h_p),
                _pad2(wr, f_dst_p, h_p, bf16))

    u, it, d = params["user"], params["item"], params["dec"]
    u1 = conv_w(u["conv1"], fp_p, fp_p)
    u2 = conv_w(u["conv2"], fp_p, h_p)
    u3 = conv_w(u["conv3"], h_p, h_p)
    u_head = (_pad2(u["lin_w"], h_p, o_p, bf16), _pad2(u["lin_b"], 1, o_p))
    i1 = conv_w(it["conv1"], fp_p, fp_p)
    i2 = conv_w(it["conv2"], h_p, h_p)
    i_head = (_pad2(it["lin_w"], h_p, o_p, bf16), _pad2(it["lin_b"], 1, o_p))

    # ---- conv1 of both encoders: one pass over adj_pp, two epilogues ----
    prod_h, item_h = fused_sage_conv_dual(adj_pp_p, x_prod_p, x_prod_p, u1, i1)

    # ---- UserGNNEncoder ----
    cust_h = fused_sage_conv(adj_pc_p, x_prod_p, x_cust_p, *u2)          # conv2 + relu
    z_cust = fused_sage_conv(adj_pc_p, prod_h.astype(bf16),
                             cust_h.astype(bf16), *u3, head=u_head)      # conv3+relu+lin

    # ---- ItemGNNEncoder ----
    z_prod = fused_sage_conv(adj_pp_p, item_h.astype(bf16),
                             item_h.astype(bf16), *i2, head=i_head)      # conv2+relu+lin

    # ---- EdgeDecoder ----
    row, col = edge_label_index[0], edge_label_index[1]
    e = row.shape[0]
    e_p = _round_up(e, LANE)
    # TODO(synk): fuse this endpoint gather into edge_decoder with scalar-prefetch
    # row/col indices + pl.Element index_map instead of JAX fancy indexing.
    zs = jnp.zeros((e_p, o_p), bf16).at[:e].set(z_cust[row].astype(bf16))
    zd = jnp.zeros((e_p, o_p), bf16).at[:e].set(z_prod[col].astype(bf16))

    d_w1s = _pad2(d["w1s"], o_p, o_p, bf16)
    d_w1d = _pad2(d["w1d"], o_p, o_p, bf16)
    d_b1 = _pad2(d["b1"], 1, o_p)
    d_w2 = _pad2(d["w2"], o_p, LANE, bf16)    # lane-dense (out_ch,1) -> (o_p,128)
    d_b2 = _pad2(d["b2"], 1, LANE)

    dec = edge_decoder(zs, zd, d_w1s, d_w1d, d_b1, d_w2, d_b2)           # (e_p, 128)
    return dec[:e, :1]


# pure-f32 JAX reference mirroring the PyTorch module (used as a correctness gate)
def _reference_forward(params, customer_ids, x_prod, ei_pp, ei_pc, edge_label_index,
                       n_cust, n_prod):
    def conv(adj, xs, xd, w):
        wl, bl, wr = w
        return jnp.maximum(adj @ xs @ wl + bl + xd @ wr, 0.0)

    x_cust = params["emb"][customer_ids]
    adj_pp = build_mean_adj(ei_pp, n_prod, n_prod)
    adj_pc = build_mean_adj(ei_pc, n_prod, n_cust)
    u, it, d = params["user"], params["item"], params["dec"]
    ph = conv(adj_pp, x_prod, x_prod, u["conv1"])
    ch = conv(adj_pc, x_prod, x_cust, u["conv2"])
    ch = conv(adj_pc, ph, ch, u["conv3"])
    z_c = ch @ u["lin_w"] + u["lin_b"]
    ih = conv(adj_pp, x_prod, x_prod, it["conv1"])
    ih = conv(adj_pp, ih, ih, it["conv2"])
    z_p = ih @ it["lin_w"] + it["lin_b"]
    row, col = edge_label_index[0], edge_label_index[1]
    h = jnp.maximum(z_c[row] @ d["w1s"] + z_p[col] @ d["w1d"] + d["b1"], 0.0)
    return h @ d["w2"] + d["b2"]


# --------------------------------- driver ------------------------------------


if __name__ == "__main__":
    key = jax.random.PRNGKey(0)
    num_customers = 20   # embedding table rows
    n_cust = 8           # customer nodes in the mini-graph
    n_prod = 12          # product nodes
    f_prod = 16          # raw product feature dim (SAGEConv lazy in_channels)
    hidden = 32
    out_ch = 16
    e_pp, e_pc, e_lbl = 24, 24, 8

    ks = jax.random.split(key, 8)
    customer_ids = jax.random.randint(ks[0], (n_cust,), 0, num_customers)
    x_prod = jax.random.normal(ks[1], (n_prod, f_prod), jnp.float32)
    ei_pp = jax.random.randint(ks[2], (2, e_pp), 0, n_prod)               # product->product
    ei_pc = jnp.stack([jax.random.randint(ks[3], (e_pc,), 0, n_prod),     # src: product
                       jax.random.randint(ks[4], (e_pc,), 0, n_cust)])    # dst: customer
    edge_label_index = jnp.stack([jax.random.randint(ks[5], (e_lbl,), 0, n_cust),
                                  jax.random.randint(ks[6], (e_lbl,), 0, n_prod)])

    params = init_params(ks[7], num_customers, f_prod, hidden, out_ch)

    out = meta_sage_forward(params, customer_ids, x_prod, ei_pp, ei_pc,
                            edge_label_index, n_cust, n_prod)
    jax.block_until_ready(out)
    assert out.shape == (e_lbl, 1) and out.dtype == jnp.float32

    ref = _reference_forward(params, customer_ids, x_prod, ei_pp, ei_pc,
                             edge_label_index, n_cust, n_prod)
    assert jnp.allclose(out, ref, atol=5e-2, rtol=5e-2), (out, ref)

    print("KERNEL_OK")
</pallas_src>

<mosaic_0001>
module attributes {stable_mosaic.version = 11 : i64} {
  func.func @_fused_sage_dual_kernel(%arg0: i32, %arg1: i32, %arg2: memref<128x128xbf16, #tpu.memory_space<vmem>>, %arg3: memref<128x128xbf16, #tpu.memory_space<vmem>>, %arg4: memref<128x128xbf16, #tpu.memory_space<vmem>>, %arg5: memref<128x128xbf16, #tpu.memory_space<vmem>>, %arg6: memref<1x128xf32, #tpu.memory_space<vmem>>, %arg7: memref<128x128xbf16, #tpu.memory_space<vmem>>, %arg8: memref<128x128xbf16, #tpu.memory_space<vmem>>, %arg9: memref<1x128xf32, #tpu.memory_space<vmem>>, %arg10: memref<128x128xbf16, #tpu.memory_space<vmem>>, %arg11: memref<128x128xf32, #tpu.memory_space<vmem>>, %arg12: memref<128x128xf32, #tpu.memory_space<vmem>>, %arg13: memref<128x128xf32, #tpu.memory_space<vmem>>) attributes {dimension_semantics = [#tpu.dimension_semantics<parallel>, #tpu.dimension_semantics<arbitrary>], iteration_bounds = array<i64: 1, 1>, scalar_prefetch = 0 : i64, scratch_operands = 1 : i64, tpu.core_type = #tpu.core_type<tc>, window_params = [{transform_indices = @transform_0, window_bounds = array<i64: 128, 128>}, {transform_indices = @transform_1, window_bounds = array<i64: 128, 128>}, {transform_indices = @transform_2, window_bounds = array<i64: 128, 128>}, {pipeline_mode = #tpu.pipeline_mode<synchronous>, transform_indices = @transform_3, window_bounds = array<i64: 128, 128>}, {pipeline_mode = #tpu.pipeline_mode<synchronous>, transform_indices = @transform_4, window_bounds = array<i64: 1, 128>}, {pipeline_mode = #tpu.pipeline_mode<synchronous>, transform_indices = @transform_5, window_bounds = array<i64: 128, 128>}, {pipeline_mode = #tpu.pipeline_mode<synchronous>, transform_indices = @transform_6, window_bounds = array<i64: 128, 128>}, {pipeline_mode = #tpu.pipeline_mode<synchronous>, transform_indices = @transform_7, window_bounds = array<i64: 1, 128>}, {pipeline_mode = #tpu.pipeline_mode<synchronous>, transform_indices = @transform_8, window_bounds = array<i64: 128, 128>}, {transform_indices = @transform_9, window_bounds = array<i64: 128, 128>}, {transform_indices = @transform_10, window_bounds = array<i64: 128, 128>}]} {
    %c0_i32 = arith.constant 0 : i32
    %0 = arith.cmpi eq, %arg1, %c0_i32 : i32
    %1 = arith.extui %0 : i1 to i32
    %c0_i32_0 = arith.constant 0 : i32
    %2 = arith.cmpi ne, %1, %c0_i32_0 : i32
    scf.if %2 {
      %cst_10 = arith.constant 0.000000e+00 : f32
      %12 = vector.broadcast %cst_10 : f32 to vector<128x128xf32>
      %c0_11 = arith.constant 0 : index
      %c0_12 = arith.constant 0 : index
      %13 = vector.load %arg13[%c0_11, %c0_12] : memref<128x128xf32, #tpu.memory_space<vmem>>, vector<128x128xf32>
      tpu.vector_store %arg13[%c0_11, %c0_12], %12 {strides = array<i32>} : memref<128x128xf32, #tpu.memory_space<vmem>>, vector<128x128xf32>,
    } else {
    }
    %c0 = arith.constant 0 : index
    %c0_1 = arith.constant 0 : index
    %3 = vector.load %arg13[%c0, %c0_1] : memref<128x128xf32, #tpu.memory_space<vmem>>, vector<128x128xf32>
    %c0_2 = arith.constant 0 : index
    %c0_3 = arith.constant 0 : index
    %4 = vector.load %arg2[%c0_2, %c0_3] : memref<128x128xbf16, #tpu.memory_space<vmem>>, vector<128x128xbf16>
    %c0_4 = arith.constant 0 : index
    %c0_5 = arith.constant 0 : index
    %5 = vector.load %arg3[%c0_4, %c0_5] : memref<128x128xbf16, #tpu.memory_space<vmem>>, vector<128x128xbf16>
    %cst = arith.constant dense<0.000000e+00> : vector<128x128xf32>
    %6 = tpu.matmul %4, %5, %cst {dimension_numbers = #tpu.dot_dimension_numbers<[1], [0], [0], [1], [0, 0, 1, 1], [], []>} : vector<128x128xbf16>, vector<128x128xbf16>, vector<128x128xf32> -> vector<128x128xf32>
    %7 = arith.addf %3, %6 : vector<128x128xf32>
    %c0_6 = arith.constant 0 : index
    %c0_7 = arith.constant 0 : index
    %8 = vector.load %arg13[%c0_6, %c0_7] : memref<128x128xf32, #tpu.memory_space<vmem>>, vector<128x128xf32>
    tpu.vector_store %arg13[%c0_6, %c0_7], %7 {strides = array<i32>} : memref<128x128xf32, #tpu.memory_space<vmem>>, vector<128x128xf32>,
    %c0_i32_8 = arith.constant 0 : i32
    %9 = arith.cmpi eq, %arg1, %c0_i32_8 : i32
    %10 = arith.extui %9 : i1 to i32
    %c0_i32_9 = arith.constant 0 : i32
    %11 = arith.cmpi ne, %10, %c0_i32_9 : i32
    scf.if %11 {
      %c0_10 = arith.constant 0 : index
      %c0_11 = arith.constant 0 : index
      %12 = vector.load %arg13[%c0_10, %c0_11] : memref<128x128xf32, #tpu.memory_space<vmem>>, vector<128x128xf32>
      %13 = arith.truncf %12 : vector<128x128xf32> to vector<128x128xbf16>
      %c0_12 = arith.constant 0 : index
      %c0_13 = arith.constant 0 : index
      %14 = vector.load %arg4[%c0_12, %c0_13] : memref<128x128xbf16, #tpu.memory_space<vmem>>, vector<128x128xbf16>
      %c0_14 = arith.constant 0 : index
      %c0_15 = arith.constant 0 : index
      %15 = vector.load %arg7[%c0_14, %c0_15] : memref<128x128xbf16, #tpu.memory_space<vmem>>, vector<128x128xbf16>
      %cst_16 = arith.constant dense<0.000000e+00> : vector<128x128xf32>
      %16 = tpu.matmul %14, %15, %cst_16 {dimension_numbers = #tpu.dot_dimension_numbers<[1], [0], [0], [1], [0, 0, 1, 1], [], []>} : vector<128x128xbf16>, vector<128x128xbf16>, vector<128x128xf32> -> vector<128x128xf32>
      %c0_17 = arith.constant 0 : index
      %c0_18 = arith.constant 0 : index
      %17 = vector.load %arg4[%c0_17, %c0_18] : memref<128x128xbf16, #tpu.memory_space<vmem>>, vector<128x128xbf16>
      %c0_19 = arith.constant 0 : index
      %c0_20 = arith.constant 0 : index
      %18 = vector.load %arg10[%c0_19, %c0_20] : memref<128x128xbf16, #tpu.memory_space<vmem>>, vector<128x128xbf16>
      %cst_21 = arith.constant dense<0.000000e+00> : vector<128x128xf32>
      %19 = tpu.matmul %17, %18, %cst_21 {dimension_numbers = #tpu.dot_dimension_numbers<[1], [0], [0], [1], [0, 0, 1, 1], [], []>} : vector<128x128xbf16>, vector<128x128xbf16>, vector<128x128xf32> -> vector<128x128xf32>
      %c0_22 = arith.constant 0 : index
      %c0_23 = arith.constant 0 : index
      %20 = vector.load %arg5[%c0_22, %c0_23] : memref<128x128xbf16, #tpu.memory_space<vmem>>, vector<128x128xbf16>
      %cst_24 = arith.constant dense<0.000000e+00> : vector<128x128xf32>
      %21 = tpu.matmul %13, %20, %cst_24 {dimension_numbers = #tpu.dot_dimension_numbers<[1], [0], [0], [1], [0, 0, 1, 1], [], []>} : vector<128x128xbf16>, vector<128x128xbf16>, vector<128x128xf32> -> vector<128x128xf32>
      %22 = arith.addf %21, %16 : vector<128x128xf32>
      %c0_25 = arith.constant 0 : index
      %c0_26 = arith.constant 0 : index
      %23 = vector.load %arg6[%c0_25, %c0_26] : memref<1x128xf32, #tpu.memory_space<vmem>>, vector<1x128xf32>
      %24 = vector.broadcast %23 : vector<1x128xf32> to vector<128x128xf32>
      %25 = arith.addf %22, %24 : vector<128x128xf32>
      %c0_27 = arith.constant 0 : index
      %c0_28 = arith.constant 0 : index
      %26 = vector.load %arg8[%c0_27, %c0_28] : memref<128x128xbf16, #tpu.memory_space<vmem>>, vector<128x128xbf16>
      %cst_29 = arith.constant dense<0.000000e+00> : vector<128x128xf32>
      %27 = tpu.matmul %13, %26, %cst_29 {dimension_numbers = #tpu.dot_dimension_numbers<[1], [0], [0], [1], [0, 0, 1, 1], [], []>} : vector<128x128xbf16>, vector<128x128xbf16>, vector<128x128xf32> -> vector<128x128xf32>
      %28 = arith.addf %27, %19 : vector<128x128xf32>
      %c0_30 = arith.constant 0 : index
      %c0_31 = arith.constant 0 : index
      %29 = vector.load %arg9[%c0_30, %c0_31] : memref<1x128xf32, #tpu.memory_space<vmem>>, vector<1x128xf32>
      %30 = vector.broadcast %29 : vector<1x128xf32> to vector<128x128xf32>
      %31 = arith.addf %28, %30 : vector<128x128xf32>
      %cst_32 = arith.constant 0.000000e+00 : f32
      %32 = vector.broadcast %cst_32 : f32 to vector<128x128xf32>
      %33 = arith.maximumf %25, %32 : vector<128x128xf32>
      %c0_33 = arith.constant 0 : index
      %c0_34 = arith.constant 0 : index
      %34 = vector.load %arg11[%c0_33, %c0_34] : memref<128x128xf32, #tpu.memory_space<vmem>>, vector<128x128xf32>
      tpu.vector_store %arg11[%c0_33, %c0_34], %33 {strides = array<i32>} : memref<128x128xf32, #tpu.memory_space<vmem>>, vector<128x128xf32>,
      %cst_35 = arith.constant 0.000000e+00 : f32
      %35 = vector.broadcast %cst_35 : f32 to vector<128x128xf32>
      %36 = arith.maximumf %31, %35 : vector<128x128xf32>
      %c0_36 = arith.constant 0 : index
      %c0_37 = arith.constant 0 : index
      %37 = vector.load %arg12[%c0_36, %c0_37] : memref<128x128xf32, #tpu.memory_space<vmem>>, vector<128x128xf32>
      tpu.vector_store %arg12[%c0_36, %c0_37], %36 {strides = array<i32>} : memref<128x128xf32, #tpu.memory_space<vmem>>, vector<128x128xf32>,
    } else {
    }
    return
  }
  func.func @transform_0(%arg0: i32, %arg1: i32) -> (i32, i32) {
    %c0_i32 = arith.constant 0 : i32
    return %arg0, %arg1 : i32, i32
  }
  func.func @transform_1(%arg0: i32, %arg1: i32) -> (i32, i32) {
    %c0_i32 = arith.constant 0 : i32
    %c0_i32_0 = arith.constant 0 : i32
    return %arg1, %c0_i32 : i32, i32
  }
  func.func @transform_2(%arg0: i32, %arg1: i32) -> (i32, i32) {
    %c0_i32 = arith.constant 0 : i32
    %c0_i32_0 = arith.constant 0 : i32
    return %arg0, %c0_i32 : i32, i32
  }
  func.func @transform_3(%arg0: i32, %arg1: i32) -> (i32, i32) {
    %c0_i32 = arith.constant 0 : i32
    %c0_i32_0 = arith.constant 0 : i32
    %c0_i32_1 = arith.constant 0 : i32
    return %c0_i32, %c0_i32_0 : i32, i32
  }
  func.func @transform_4(%arg0: i32, %arg1: i32) -> (i32, i32) {
    %c0_i32 = arith.constant 0 : i32
    %c0_i32_0 = arith.constant 0 : i32
    %c0_i32_1 = arith.constant 0 : i32
    return %c0_i32, %c0_i32_0 : i32, i32
  }
  func.func @transform_5(%arg0: i32, %arg1: i32) -> (i32, i32) {
    %c0_i32 = arith.constant 0 : i32
    %c0_i32_0 = arith.constant 0 : i32
    %c0_i32_1 = arith.constant 0 : i32
    return %c0_i32, %c0_i32_0 : i32, i32
  }
  func.func @transform_6(%arg0: i32, %arg1: i32) -> (i32, i32) {
    %c0_i32 = arith.constant 0 : i32
    %c0_i32_0 = arith.constant 0 : i32
    %c0_i32_1 = arith.constant 0 : i32
    return %c0_i32, %c0_i32_0 : i32, i32
  }
  func.func @transform_7(%arg0: i32, %arg1: i32) -> (i32, i32) {
    %c0_i32 = arith.constant 0 : i32
    %c0_i32_0 = arith.constant 0 : i32
    %c0_i32_1 = arith.constant 0 : i32
    return %c0_i32, %c0_i32_0 : i32, i32
  }
  func.func @transform_8(%arg0: i32, %arg1: i32) -> (i32, i32) {
    %c0_i32 = arith.constant 0 : i32
    %c0_i32_0 = arith.constant 0 : i32
    %c0_i32_1 = arith.constant 0 : i32
    return %c0_i32, %c0_i32_0 : i32, i32
  }
  func.func @transform_9(%arg0: i32, %arg1: i32) -> (i32, i32) {
    %c0_i32 = arith.constant 0 : i32
    %c0_i32_0 = arith.constant 0 : i32
    return %arg0, %c0_i32 : i32, i32
  }
  func.func @transform_10(%arg0: i32, %arg1: i32) -> (i32, i32) {
    %c0_i32 = arith.constant 0 : i32
    %c0_i32_0 = arith.constant 0 : i32
    return %arg0, %c0_i32 : i32, i32
  }
}

</mosaic_0001>

<bundles_post_ra>
// kernel: tpu_custom_call.1
= control target key start
LH: loop header
LB: loop body
LE: loop exit
PB: predicated region body
PF: predicated region fallthrough
CT: control target
= control target key end

     0   :  { %16 = vsyncpa [#allocation4], 0  ;;  %s1782_s0 = inlined_call_operand.hbm [shape: bf16[128,128], index: 0, kind: input, shape index: {}]   ;;  %s1783_s1 = inlined_call_operand.hbm [shape: bf16[128,128], index: 1, kind: input, shape index: {}]   ;;  %s1784_s2 = inlined_call_operand.hbm [shape: bf16[128,128], index: 2, kind: input, shape index: {}]   ;;  %s1785_s3 = inlined_call_operand.hbm [shape: bf16[128,128], index: 3, kind: input, shape index: {}]   ;;  %s1786_s4 = inlined_call_operand.vmem [shape: f32[1,128], index: 4, kind: input, shape index: {}]   ;;  %s1787_s5 = inlined_call_operand.hbm [shape: bf16[128,128], index: 5, kind: input, shape index: {}]   ;;  %s1788_s6 = inlined_call_operand.hbm [shape: bf16[128,128], index: 6, kind: input, shape index: {}]   ;;  %s1789_s7 = inlined_call_operand.vmem [shape: f32[1,128], index: 7, kind: input, shape index: {}]   ;;  %s1790_s8 = inlined_call_operand.hbm [shape: bf16[128,128], index: 8, kind: input, shape index: {}]   ;;  %s1791_s9 = inlined_call_operand.hbm [shape: f32[128,128], index: 9, kind: output, shape index: {0}]   ;;  %s1792_s10 = inlined_call_operand.hbm [shape: f32[128,128], index: 10, kind: output, shape index: {1}]  }
   0x1   :  { %17 = vsyncpa [#allocation7], 0 }
   0x2   :  { %18 = vsyncpa [#allocation10], 0 }
   0x3   :  { %19 = vsyncpa [#allocation13], 0 }
   0x4   :  { %20 = vsyncpa [#allocation5], 0 }
   0x5   :  { %21 = vsyncpa [#allocation17], 0  ;;  %s39_s15 = sshll.u32 %s1783_s1, 4  ;;  %s1624_s16 = smov [#allocation6]   ;;  %s40_s15 = int_to_ptr.hbm [resolvable:$true] %s39_s15 }
   0x6   :  { %s41_s17 = sshll.u32 %s1624_s16, 4  ;;  %s65_s20 = sshll.u32 %s1785_s3, 4  ;;  %s42_s17 = int_to_ptr.vmem [resolvable:$true] %s41_s17  ;;  %s66_s20 = int_to_ptr.hbm [resolvable:$true] %s65_s20 }
   0x7   :  { %s1625_s21 = smov 64   ;;  %s1626_s22 = smov 4  }
   0x8   :  { %47 = dma.hbm_to_vmem [thread:$0]  %s40_s15, 1024, %s42_s17, [#allocation7], %s1625_s21, %s1625_s21, %s1626_s22  }
   0x9   :  { %s1627_s23 = smov [#allocation9]   ;;  %s93_s1 = sshll.u32 %s1788_s6, 4  ;;  %s94_s1 = int_to_ptr.hbm [resolvable:$true] %s93_s1 }
   0xa   :  { %s67_s24 = sshll.u32 %s1627_s23, 4  ;;  %s26_s28 = sshll.u32 %s1782_s0, 4  ;;  %s68_s24 = int_to_ptr.vmem [resolvable:$true] %s67_s24  ;;  %s27_s28 = int_to_ptr.hbm [resolvable:$true] %s26_s28 }
   0xb   :  { %73 = dma.hbm_to_vmem [thread:$0]  %s66_s20, 1024, %s68_s24, [#allocation10], %s1625_s21, %s1625_s21, %s1626_s22  }
   0xc   :  { %s1628_s29 = smov [#allocation12]   ;;  %s1629_s11 = smov [#allocation3]  }
   0xd   :  { %s95_s30 = sshll.u32 %s1628_s29, 4  ;;  %s28_s6 = sshll.u32 %s1629_s11, 4  ;;  %s96_s30 = int_to_ptr.vmem [resolvable:$true] %s95_s30  ;;  %s29_s6 = int_to_ptr.vmem [resolvable:$true] %s28_s6 }
   0xe   :  { %101 = dma.hbm_to_vmem [thread:$0]  %s94_s1, 1024, %s96_s30, [#allocation13], %s1625_s21, %s1625_s21, %s1626_s22  }
   0xf   :  { %s52_s14 = sshll.u32 %s1784_s2, 4  ;;  %s80_s16 = sshll.u32 %s1787_s5, 4  ;;  %s53_s14 = int_to_ptr.hbm [resolvable:$true] %s52_s14  ;;  %s81_s16 = int_to_ptr.hbm [resolvable:$true] %s80_s16 }
  0x10   :  { %34 = dma.hbm_to_vmem [thread:$0]  %s27_s28, 1024, %s29_s6, [#allocation4], %s1625_s21, %s1625_s21, %s1626_s22  }
  0x11   :  { %s1630_s17 = smov [#allocation8]   ;;  %s1631_s19 = smov [#allocation11]  }
  0x12   :  { %s54_s18 = sshll.u32 %s1630_s17, 4  ;;  %s82_s2 = sshll.u32 %s1631_s19, 4  ;;  %s55_s18 = int_to_ptr.vmem [resolvable:$true] %s54_s18  ;;  %s83_s2 = int_to_ptr.vmem [resolvable:$true] %s82_s2 }
  0x13   :  { %60 = dma.hbm_to_vmem [thread:$0]  %s53_s14, 1024, %s55_s18, [#allocation7], %s1625_s21, %s1625_s21, %s1626_s22  }
  0x14   :  { %s108_s24 = sshll.u32 %s1790_s8, 4  ;;  %s1632_s5 = smov [#allocation14]   ;;  %s109_s24 = int_to_ptr.hbm [resolvable:$true] %s108_s24 }
  0x15   :  { %88 = dma.hbm_to_vmem [thread:$0]  %s81_s16, 1024, %s83_s2, [#allocation10], %s1625_s21, %s1625_s21, %s1626_s22  }
  0x16   :  { %s110_s25 = sshll.u32 %s1632_s5, 4  ;;  %s111_s25 = int_to_ptr.vmem [resolvable:$true] %s110_s25 }
  0x17   :  { %116 = dma.hbm_to_vmem [thread:$0]  %s109_s24, 1024, %s111_s25, [#allocation13], %s1625_s21, %s1625_s21, %s1626_s22  }
  0x18   :  { %1612 = dma.done.wait [#allocation4], 1024  }
  0x19   :  { %1613 = vsyncadd [#allocation4], 4294966272 }
  0x1a   :  { %1614 = dma.done.wait [#allocation7], 2048  }
  0x1b   :  { %1615 = vsyncadd [#allocation7], 4294965248 }
  0x1c   :  { %1616 = dma.done.wait [#allocation10], 2048  }
  0x1d   :  { %1617 = vsyncadd [#allocation10], 4294965248 }
  0x1e   :  { %1618 = dma.done.wait [#allocation13], 2048  }
  0x1f   :  { %1619 = vsyncadd [#allocation13], 4294965248  ;;  %v1316_v0 = vld [vmem:[#allocation6 + $0x38] sm:$0xff]  ;;  %v1315_v1 = vld [vmem:[#allocation6 + $0x30] sm:$0xff]  ;;  %s1056_s27 = sshll.u32 %s1792_s10, 4  ;;  %s1634_s28 = smov [#allocation15]   ;;  %s1057_s27 = int_to_ptr.hbm [resolvable:$true] %s1056_s27 }
  0x20   :  { %309 = vmatpush.bf16.msra.mxu0 %v1316_v0  ;;  %1357 = vmatpush.bf16.msra.mxu1 %v1316_v0  ;;  %v1314_v2 = vld [vmem:[#allocation6 + $0x28] sm:$0xff]  ;;  %v1313_v3 = vld [vmem:[#allocation6 + $0x20] sm:$0xff]  ;;  %v1312_v4 = vld [vmem:[#allocation6 + $0x18] sm:$0xff]  ;;  %s1041_s29 = sshll.u32 %s1634_s28, 4  ;;  %s1043_s6 = sshll.u32 %s1791_s9, 4  ;;  %s1042_s29 = int_to_ptr.vmem [resolvable:$true] %s1041_s29  ;;  %s1044_s6 = int_to_ptr.hbm [resolvable:$true] %s1043_s6 }
  0x21   :  { %1358 = vmatpush.bf16.msra.mxu2 %v1316_v0  ;;  %1359 = vmatpush.bf16.msra.mxu3 %v1316_v0  ;;  %v1311_v5 = vld [vmem:[#allocation6 + $0x10] sm:$0xff]  ;;  %v1310_v6 = vld [vmem:[#allocation6 + $0x8] sm:$0xff]  ;;  %v1309_v7 = vld [vmem:[#allocation6] sm:$0xff]  ;;  %s1635_s12 = smov 128   ;;  %s1636_s13 = smov 8  }
  0x22   :  { %v1340_v8 = vld [vmem:[#allocation14 + $0x38] sm:$0xff]  ;;  %v1301_v10 = vld [vmem:[#allocation3] sm:$0xff]  ;;  %v1303_v11 = vld [vmem:[#allocation3 + $0x10] sm:$0xff] }
  0x23   :  { %v1332_v9 = vld [vmem:[#allocation11 + $0x38] sm:$0xff]  ;;  %v1305_v12 = vld [vmem:[#allocation3 + $0x20] sm:$0xff]  ;;  %v1307_v13 = vld [vmem:[#allocation3 + $0x30] sm:$0xff] }
  0x24   :  { %310 = vmatpush.bf16.msra.mxu0 %v1315_v1  ;;  %1360 = vmatpush.bf16.msra.mxu1 %v1315_v1  ;;  %v1348_v14 = vld [vmem:[#allocation9 + $0x38] sm:$0xff]  ;;  %v1339_v16 = vld [vmem:[#allocation14 + $0x30] sm:$0xff]  ;;  %v1338_v20 = vld [vmem:[#allocation14 + $0x28] sm:$0xff] }
  0x25   :  { %1361 = vmatpush.bf16.msra.mxu2 %v1315_v1  ;;  %1362 = vmatpush.bf16.msra.mxu3 %v1315_v1  ;;  %v1356_v15 = vld [vmem:[#allocation12 + $0x38] sm:$0xff]  ;;  %v1331_v17 = vld [vmem:[#allocation11 + $0x30] sm:$0xff]  ;;  %v1330_v21 = vld [vmem:[#allocation11 + $0x28] sm:$0xff] }
  0x26   :  { %v1347_v18 = vld [vmem:[#allocation9 + $0x30] sm:$0xff]  ;;  %v1346_v22 = vld [vmem:[#allocation9 + $0x28] sm:$0xff]  ;;  %v1337_v24 = vld [vmem:[#allocation14 + $0x20] sm:$0xff] }
  0x27   :  { %v1355_v19 = vld [vmem:[#allocation12 + $0x30] sm:$0xff]  ;;  %v1354_v23 = vld [vmem:[#allocation12 + $0x28] sm:$0xff]  ;;  %v1329_v25 = vld [vmem:[#allocation11 + $0x20] sm:$0xff] }
  0x28   :  { %311 = vmatpush.bf16.msra.mxu0 %v1314_v2  ;;  %1363 = vmatpush.bf16.msra.mxu1 %v1314_v2  ;;  %v1345_v26 = vld [vmem:[#allocation9 + $0x20] sm:$0xff]  ;;  %v1336_v28 = vld [vmem:[#allocation14 + $0x18] sm:$0xff]  ;;  %v1302_v30 = vld [vmem:[#allocation3 + $0x8] sm:$0xff] }
  0x29   :  { %1364 = vmatpush.bf16.msra.mxu2 %v1314_v2  ;;  %1365 = vmatpush.bf16.msra.mxu3 %v1314_v2  ;;  %v1353_v27 = vld [vmem:[#allocation12 + $0x20] sm:$0xff]  ;;  %v1328_v29 = vld [vmem:[#allocation11 + $0x18] sm:$0xff]  ;;  %v1306_v32 = vld [vmem:[#allocation3 + $0x28] sm:$0xff] }
  0x2a   :  { %v1304_v31 = vld [vmem:[#allocation3 + $0x18] sm:$0xff]  ;;  %v1335_v36 = vld [vmem:[#allocation14 + $0x10] sm:$0xff]  ;;  %v1334_v39 = vld [vmem:[#allocation14 + $0x8] sm:$0xff] }
  0x2b   :  { %v1308_v33 = vld [vmem:[#allocation3 + $0x38] sm:$0xff]  ;;  %v1327_v37 = vld [vmem:[#allocation11 + $0x10] sm:$0xff]  ;;  %v1333_v40 = vld [vmem:[#allocation14] sm:$0xff] }
  0x2c   :  { %312 = vmatpush.bf16.msra.mxu0 %v1313_v3  ;;  %1366 = vmatpush.bf16.msra.mxu1 %v1313_v3  ;;  %v1344_v34 = vld [vmem:[#allocation9 + $0x18] sm:$0xff]  ;;  %v1343_v38 = vld [vmem:[#allocation9 + $0x10] sm:$0xff]  ;;  %v1326_v42 = vld [vmem:[#allocation11 + $0x8] sm:$0xff] }
  0x2d   :  { %1367 = vmatpush.bf16.msra.mxu2 %v1313_v3  ;;  %1368 = vmatpush.bf16.msra.mxu3 %v1313_v3  ;;  %v1352_v35 = vld [vmem:[#allocation12 + $0x18] sm:$0xff]  ;;  %v1351_v41 = vld [vmem:[#allocation12 + $0x10] sm:$0xff]  ;;  %v1317_v43 = vld [vmem:[#allocation8] sm:$0xff] }
  0x2e   :  { %v1342_v44 = vld [vmem:[#allocation9 + $0x8] sm:$0xff]  ;;  %v1325_v46 = vld [vmem:[#allocation11] sm:$0xff]  ;;  %v1319_v50 = vld [vmem:[#allocation8 + $0x10] sm:$0xff] }
  0x2f   :  { %v1350_v45 = vld [vmem:[#allocation12 + $0x8] sm:$0xff]  ;;  %v1341_v47 = vld [vmem:[#allocation9] sm:$0xff]  ;;  %v1320_v54 = vld [vmem:[#allocation8 + $0x18] sm:$0xff] }
  0x30   :  { %313 = vmatpush.bf16.msra.mxu0 %v1312_v4  ;;  %1369 = vmatpush.bf16.msra.mxu1 %v1312_v4  ;;  %v1349_v48 = vld [vmem:[#allocation12] sm:$0xff]  ;;  %v1318_v49 = vld [vmem:[#allocation8 + $0x8] sm:$0xff]  ;;  %v1323_v3 = vld [vmem:[#allocation8 + $0x30] sm:$0xff] }
  0x31   :  { %1370 = vmatpush.bf16.msra.mxu2 %v1312_v4  ;;  %1371 = vmatpush.bf16.msra.mxu3 %v1312_v4  ;;  %v1321_v59 = vld [vmem:[#allocation8 + $0x20] sm:$0xff]  ;;  %v1322_v63 = vld [vmem:[#allocation8 + $0x28] sm:$0xff] }
  0x34   :  { %314 = vmatpush.bf16.msra.mxu0 %v1311_v5  ;;  %1372 = vmatpush.bf16.msra.mxu1 %v1311_v5 }
  0x35   :  { %1373 = vmatpush.bf16.msra.mxu2 %v1311_v5  ;;  %1374 = vmatpush.bf16.msra.mxu3 %v1311_v5 }
  0x38   :  { %315 = vmatpush.bf16.msra.mxu0 %v1310_v6  ;;  %1375 = vmatpush.bf16.msra.mxu1 %v1310_v6 }
  0x39   :  { %1376 = vmatpush.bf16.msra.mxu2 %v1310_v6  ;;  %1377 = vmatpush.bf16.msra.mxu3 %v1310_v6 }
  0x3c   :  { %316 = vmatpush.bf16.msra.mxu0 %v1309_v7  ;;  %1378 = vmatpush.bf16.msra.mxu1 %v1309_v7 }
  0x3d   :  { %1379 = vmatpush.bf16.msra.mxu2 %v1309_v7  ;;  %1380 = vmatpush.bf16.msra.mxu3 %v1309_v7  ;;  %v1324_v7 = vld [vmem:[#allocation8 + $0x38] sm:$0xff] }
  0x3f   :  { %317 = vmatmul.bf16.vlgmr.msra.gmra.mxu0 %v1301_v10  ;;  %327 = vmatmul.bf16.vlgmr.msra.gmra.mxu1 %v1303_v11 }
  0x40   :  { %545 = vmatpush.bf16.msrb.mxu1 %v1332_v9  ;;  %337 = vmatmul.bf16.vlgmr.msra.gmra.mxu2 %v1305_v12 }
  0x41   :  { %658 = vmatpush.bf16.msrb.mxu2 %v1340_v8  ;;  %347 = vmatmul.bf16.vlgmr.msra.gmra.mxu3 %v1307_v13 }
  0x42   :  { %771 = vmatpush.bf16.msrb.mxu3 %v1348_v14  ;;  %904 = vmatpush.bf16.msrb.mxu0 %v1356_v15 }
  0x44   :  { %546 = vmatpush.bf16.msrb.mxu1 %v1331_v17 }
  0x45   :  { %659 = vmatpush.bf16.msrb.mxu2 %v1339_v16 }
  0x46   :  { %772 = vmatpush.bf16.msrb.mxu3 %v1347_v18  ;;  %905 = vmatpush.bf16.msrb.mxu0 %v1355_v19 }
  0x48   :  { %547 = vmatpush.bf16.msrb.mxu1 %v1330_v21 }
  0x49   :  { %660 = vmatpush.bf16.msrb.mxu2 %v1338_v20 }
  0x4a   :  { %773 = vmatpush.bf16.msrb.mxu3 %v1346_v22  ;;  %906 = vmatpush.bf16.msrb.mxu0 %v1354_v23  ;;  %v1737_v22 = vld [vmem:[%s1789_s7] ss:$0 sm:$0xff] }
  0x4c   :  { %548 = vmatpush.bf16.msrb.mxu1 %v1329_v25 }
  0x4d   :  { %661 = vmatpush.bf16.msrb.mxu2 %v1337_v24 }
  0x4e   :  { %774 = vmatpush.bf16.msrb.mxu3 %v1345_v26  ;;  %907 = vmatpush.bf16.msrb.mxu0 %v1353_v27 }
  0x4f   :  { %322 = vmatmul.bf16.gmra.mxu0 %v1302_v30  ;;  %332 = vmatmul.bf16.gmra.mxu1 %v1304_v31 }
  0x50   :  { %549 = vmatpush.bf16.msrb.mxu1 %v1328_v29  ;;  %342 = vmatmul.bf16.gmra.mxu2 %v1306_v32 }
  0x51   :  { %662 = vmatpush.bf16.msrb.mxu2 %v1336_v28  ;;  %352 = vmatmul.bf16.gmra.mxu3 %v1308_v33  ;;  %v1743_v28 = vld [vmem:[%s1786_s4] ss:$0 sm:$0xff]  ;;  %s1633_s4 = smov [#allocation16]  }
  0x52   :  { %775 = vmatpush.bf16.msrb.mxu3 %v1344_v34  ;;  %908 = vmatpush.bf16.msrb.mxu0 %v1352_v35  ;;  %s1054_s7 = sshll.u32 %s1633_s4, 4  ;;  %s1055_s7 = int_to_ptr.vmem [resolvable:$true] %s1054_s7 }
  0x54   :  { %550 = vmatpush.bf16.msrb.mxu1 %v1327_v37 }
  0x55   :  { %663 = vmatpush.bf16.msrb.mxu2 %v1335_v36 }
  0x56   :  { %776 = vmatpush.bf16.msrb.mxu3 %v1343_v38  ;;  %909 = vmatpush.bf16.msrb.mxu0 %v1351_v41 }
  0x58   :  { %551 = vmatpush.bf16.msrb.mxu1 %v1326_v42 }
  0x59   :  { %664 = vmatpush.bf16.msrb.mxu2 %v1334_v39 }
  0x5a   :  { %777 = vmatpush.bf16.msrb.mxu3 %v1342_v44  ;;  %910 = vmatpush.bf16.msrb.mxu0 %v1350_v45 }
  0x5c   :  { %552 = vmatpush.bf16.msrb.mxu1 %v1325_v46 }
  0x5d   :  { %665 = vmatpush.bf16.msrb.mxu2 %v1333_v40 }
  0x5e   :  { %778 = vmatpush.bf16.msrb.mxu3 %v1341_v47  ;;  %911 = vmatpush.bf16.msrb.mxu0 %v1349_v48 }
  0x5f   :  { %553 = vmatmul.bf16.vlgmr.msrb.gmra.mxu1 %v1317_v43 }
  0x60   :  { %666 = vmatmul.bf16.vlgmr.msrb.gmra.mxu2 %v1317_v43 }
  0x6f   :  { %558 = vmatmul.bf16.gmra.mxu1 %v1318_v49 }
  0x70   :  { %671 = vmatmul.bf16.gmra.mxu2 %v1318_v49 }
  0x7f   :  { %563 = vmatmul.bf16.gmra.mxu1 %v1319_v50 }
  0x80   :  { %676 = vmatmul.bf16.gmra.mxu2 %v1319_v50 }
  0x8f   :  { %568 = vmatmul.bf16.gmra.mxu1 %v1320_v54 }
  0x90   :  { %681 = vmatmul.bf16.gmra.mxu2 %v1320_v54 }
  0x9f   :  { %573 = vmatmul.bf16.gmra.mxu1 %v1321_v59 }
  0xa0   :  { %686 = vmatmul.bf16.gmra.mxu2 %v1321_v59 }
  0xaf   :  { %578 = vmatmul.bf16.gmra.mxu1 %v1322_v63 }
  0xb0   :  { %691 = vmatmul.bf16.gmra.mxu2 %v1322_v63 }
  0xbc   :  { %v318_v51 = vpop.f32.mrf.mxu0  ;;  %v328_v57 = vpop.f32.mrf.mxu1 }
  0xbf   :  { %583 = vmatmul.bf16.gmra.mxu1 %v1323_v3 }
  0xc0   :  { %696 = vmatmul.bf16.gmra.mxu2 %v1323_v3 }
  0xc3   :  { %v338_v1 = vpop.f32.mrf.mxu2 }
  0xc4   :  { %v320_v52 = vpop.f32.mrf.mxu0  ;;  %v330_v60 = vpop.f32.mrf.mxu1 }
  0xc5   :  { %v409_v53 = vpack.c.bf16 %v320_v52, %v318_v51  ;;  %v411_v61 = vpack.c.bf16 %v330_v60, %v328_v57  ;;  %v348_v9 = vpop.f32.mrf.mxu3 }
  0xc7   :  { %779 = vmatmul.bf16.vlgmr.msrb.gmra.mxu3 %v409_v53  ;;  %912 = vmatmul.bf16.vlgmr.msrb.gmra.mxu0 %v409_v53 }
  0xcb   :  { %v340_v4 = vpop.f32.mrf.mxu2 }
  0xcc   :  { %v323_v55 = vpop.f32.mrf.mxu0  ;;  %v333_v62 = vpop.f32.mrf.mxu1  ;;  %v413_v5 = vpack.c.bf16 %v340_v4, %v338_v1 }
  0xcd   :  { %v350_v11 = vpop.f32.mrf.mxu3 }
  0xce   :  { %v415_v12 = vpack.c.bf16 %v350_v11, %v348_v9 }
  0xcf   :  { %588 = vmatmul.bf16.gmra.mxu1 %v1324_v7 }
  0xd0   :  { %701 = vmatmul.bf16.gmra.mxu2 %v1324_v7 }
  0xd3   :  { %v343_v6 = vpop.f32.mrf.mxu2 }
  0xd4   :  { %v325_v56 = vpop.f32.mrf.mxu0  ;;  %v335_v0 = vpop.f32.mrf.mxu1 }
  0xd5   :  { %v410_v58 = vpack.c.bf16 %v325_v56, %v323_v55  ;;  %v412_v2 = vpack.c.bf16 %v335_v0, %v333_v62  ;;  %v353_v14 = vpop.f32.mrf.mxu3 }
  0xd7   :  { %784 = vmatmul.bf16.gmra.mxu3 %v410_v58  ;;  %917 = vmatmul.bf16.gmra.mxu0 %v410_v58 }
  0xdb   :  { %v345_v8 = vpop.f32.mrf.mxu2 }
  0xdc   :  { %v414_v10 = vpack.c.bf16 %v345_v8, %v343_v6  ;;  %v554_v15 = vpop.f32.mrf.mxu1 }
  0xdd   :  { %v355_v17 = vpop.f32.mrf.mxu3 }
  0xde   :  { %v416_v18 = vpack.c.bf16 %v355_v17, %v353_v14 }
  0xe3   :  { %v667_v13 = vpop.f32.mrf.mxu2 }
  0xe4   :  { %v556_v19 = vpop.f32.mrf.mxu1 }
  0xe7   :  { %789 = vmatmul.bf16.gmra.mxu3 %v411_v61  ;;  %922 = vmatmul.bf16.gmra.mxu0 %v411_v61 }
  0xeb   :  { %v669_v16 = vpop.f32.mrf.mxu2 }
  0xec   :  { %v559_v21 = vpop.f32.mrf.mxu1 }
  0xf3   :  { %v672_v20 = vpop.f32.mrf.mxu2 }
  0xf4   :  { %v561_v30 = vpop.f32.mrf.mxu1 }
  0xf7   :  { %794 = vmatmul.bf16.gmra.mxu3 %v412_v2  ;;  %927 = vmatmul.bf16.gmra.mxu0 %v412_v2 }
  0xfb   :  { %v674_v24 = vpop.f32.mrf.mxu2 }
  0xfc   :  { %v564_v42 = vpop.f32.mrf.mxu1 }
 0x103   :  { %v677_v35 = vpop.f32.mrf.mxu2 }
 0x104   :  { %v566_v54 = vpop.f32.mrf.mxu1 }
 0x107   :  { %799 = vmatmul.bf16.gmra.mxu3 %v413_v5  ;;  %932 = vmatmul.bf16.gmra.mxu0 %v413_v5 }
 0x10b   :  { %v679_v47 = vpop.f32.mrf.mxu2 }
 0x10c   :  { %v569_v2 = vpop.f32.mrf.mxu1 }
 0x113   :  { %v682_v59 = vpop.f32.mrf.mxu2 }
 0x114   :  { %v571_v14 = vpop.f32.mrf.mxu1 }
 0x117   :  { %804 = vmatmul.bf16.gmra.mxu3 %v414_v10  ;;  %937 = vmatmul.bf16.gmra.mxu0 %v414_v10 }
 0x11b   :  { %v684_v7 = vpop.f32.mrf.mxu2 }
 0x127   :  { %809 = vmatmul.bf16.gmra.mxu3 %v415_v12  ;;  %942 = vmatmul.bf16.gmra.mxu0 %v415_v12 }
 0x137   :  { %814 = vmatmul.bf16.gmra.mxu3 %v416_v18  ;;  %947 = vmatmul.bf16.gmra.mxu0 %v416_v18 }
 0x144   :  { %v913_v23 = vpop.f32.mrf.mxu0 }
 0x145   :  { %v914_v25 = vadd.f32 %v913_v23, %v667_v13 }
 0x147   :  { %v957_v26 = vadd.f32 %v1737_v22, %v914_v25 }
 0x149   :  { %v1005_v27 = vmax.f32 %v957_v26, 0.0 }
 0x14a   :  { %v780_v29 = vpop.f32.mrf.mxu3 }
 0x14b   :  { %1021 = vst [vmem:[#allocation16] sm:$0xff] %v1005_v27  ;;  %v781_v31 = vadd.f32 %v780_v29, %v554_v15  ;;  %v574_v27 = vpop.f32.mrf.mxu1 }
 0x14c   :  { %v915_v32 = vpop.f32.mrf.mxu0 }
 0x14d   :  { %v824_v33 = vadd.f32 %v1743_v28, %v781_v31  ;;  %v916_v34 = vadd.f32 %v915_v32, %v669_v16 }
 0x14f   :  { %v973_v36 = vmax.f32 %v824_v33, 0.0  ;;  %v958_v37 = vadd.f32 %v1737_v22, %v916_v34 }
 0x151   :  { %989 = vst [vmem:[#allocation15] sm:$0xff] %v973_v36  ;;  %v1006_v38 = vmax.f32 %v958_v37, 0.0 }
 0x152   :  { %v782_v39 = vpop.f32.mrf.mxu3 }
 0x153   :  { %1022 = vst [vmem:[#allocation16 + $0x8] sm:$0xff] %v1006_v38  ;;  %v783_v40 = vadd.f32 %v782_v39, %v556_v19  ;;  %v687_v19 = vpop.f32.mrf.mxu2 }
 0x154   :  { %v918_v41 = vpop.f32.mrf.mxu0 }
 0x155   :  { %v825_v43 = vadd.f32 %v1743_v28, %v783_v40  ;;  %v919_v44 = vadd.f32 %v918_v41, %v672_v20  ;;  %v576_v40 = vpop.f32.mrf.mxu1 }
 0x157   :  { %v974_v45 = vmax.f32 %v825_v43, 0.0  ;;  %v959_v46 = vadd.f32 %v1737_v22, %v919_v44 }
 0x159   :  { %990 = vst [vmem:[#allocation15 + $0x8] sm:$0xff] %v974_v45  ;;  %v1007_v48 = vmax.f32 %v959_v46, 0.0 }
 0x15a   :  { %v785_v49 = vpop.f32.mrf.mxu3 }
 0x15b   :  { %1023 = vst [vmem:[#allocation16 + $0x10] sm:$0xff] %v1007_v48  ;;  %v786_v50 = vadd.f32 %v785_v49, %v559_v21  ;;  %v689_v33 = vpop.f32.mrf.mxu2 }
 0x15c   :  { %v920_v51 = vpop.f32.mrf.mxu0 }
 0x15d   :  { %v826_v52 = vadd.f32 %v1743_v28, %v786_v50  ;;  %v921_v53 = vadd.f32 %v920_v51, %v674_v24 }
 0x15f   :  { %v975_v55 = vmax.f32 %v826_v52, 0.0  ;;  %v960_v56 = vadd.f32 %v1737_v22, %v921_v53  ;;  %v579_v52 = vpop.f32.mrf.mxu1 }
 0x161   :  { %991 = vst [vmem:[#allocation15 + $0x10] sm:$0xff] %v975_v55  ;;  %v1008_v57 = vmax.f32 %v960_v56, 0.0 }
 0x162   :  { %v787_v58 = vpop.f32.mrf.mxu3 }
 0x163   :  { %1024 = vst [vmem:[#allocation16 + $0x18] sm:$0xff] %v1008_v57  ;;  %v788_v60 = vadd.f32 %v787_v58, %v561_v30  ;;  %v692_v45 = vpop.f32.mrf.mxu2 }
 0x164   :  { %v923_v61 = vpop.f32.mrf.mxu0 }
 0x165   :  { %v827_v62 = vadd.f32 %v1743_v28, %v788_v60  ;;  %v924_v63 = vadd.f32 %v923_v61, %v677_v35 }
 0x167   :  { %v976_v0 = vmax.f32 %v827_v62, 0.0  ;;  %v961_v1 = vadd.f32 %v1737_v22, %v924_v63  ;;  %v581_v63 = vpop.f32.mrf.mxu1 }
 0x169   :  { %992 = vst [vmem:[#allocation15 + $0x18] sm:$0xff] %v976_v0  ;;  %v1009_v3 = vmax.f32 %v961_v1, 0.0 }
 0x16a   :  { %v790_v4 = vpop.f32.mrf.mxu3 }
 0x16b   :  { %1025 = vst [vmem:[#allocation16 + $0x20] sm:$0xff] %v1009_v3  ;;  %v791_v5 = vadd.f32 %v790_v4, %v564_v42  ;;  %v694_v57 = vpop.f32.mrf.mxu2 }
 0x16c   :  { %v925_v6 = vpop.f32.mrf.mxu0 }
 0x16d   :  { %v828_v8 = vadd.f32 %v1743_v28, %v791_v5  ;;  %v926_v9 = vadd.f32 %v925_v6, %v679_v47 }
 0x16f   :  { %v977_v10 = vmax.f32 %v828_v8, 0.0  ;;  %v962_v11 = vadd.f32 %v1737_v22, %v926_v9 }
 0x171   :  { %993 = vst [vmem:[#allocation15 + $0x20] sm:$0xff] %v977_v10  ;;  %v1010_v12 = vmax.f32 %v962_v11, 0.0  ;;  %v584_v11 = vpop.f32.mrf.mxu1 }
 0x172   :  { %v792_v13 = vpop.f32.mrf.mxu3 }
 0x173   :  { %1026 = vst [vmem:[#allocation16 + $0x28] sm:$0xff] %v1010_v12  ;;  %v793_v15 = vadd.f32 %v792_v13, %v566_v54  ;;  %v697_v5 = vpop.f32.mrf.mxu2 }
 0x174   :  { %v928_v16 = vpop.f32.mrf.mxu0 }
 0x175   :  { %v829_v17 = vadd.f32 %v1743_v28, %v793_v15  ;;  %v929_v18 = vadd.f32 %v928_v16, %v682_v59 }
 0x177   :  { %v978_v20 = vmax.f32 %v829_v17, 0.0  ;;  %v963_v21 = vadd.f32 %v1737_v22, %v929_v18 }
 0x179   :  { %994 = vst [vmem:[#allocation15 + $0x28] sm:$0xff] %v978_v20  ;;  %v1011_v23 = vmax.f32 %v963_v21, 0.0 }
 0x17a   :  { %v795_v24 = vpop.f32.mrf.mxu3 }
 0x17b   :  { %1027 = vst [vmem:[#allocation16 + $0x30] sm:$0xff] %v1011_v23  ;;  %v796_v25 = vadd.f32 %v795_v24, %v569_v2  ;;  %v699_v17 = vpop.f32.mrf.mxu2 }
 0x17c   :  { %v930_v26 = vpop.f32.mrf.mxu0 }
 0x17d   :  { %v830_v29 = vadd.f32 %v1743_v28, %v796_v25  ;;  %v931_v30 = vadd.f32 %v930_v26, %v684_v7  ;;  %v586_v25 = vpop.f32.mrf.mxu1 }
 0x17f   :  { %v979_v31 = vmax.f32 %v830_v29, 0.0  ;;  %v964_v32 = vadd.f32 %v1737_v22, %v931_v30 }
 0x181   :  { %995 = vst [vmem:[#allocation15 + $0x30] sm:$0xff] %v979_v31  ;;  %v1012_v34 = vmax.f32 %v964_v32, 0.0 }
 0x182   :  { %v797_v35 = vpop.f32.mrf.mxu3 }
 0x183   :  { %1028 = vst [vmem:[#allocation16 + $0x38] sm:$0xff] %v1012_v34  ;;  %v798_v36 = vadd.f32 %v797_v35, %v571_v14  ;;  %v702_v30 = vpop.f32.mrf.mxu2 }
 0x184   :  { %v933_v37 = vpop.f32.mrf.mxu0 }
 0x185   :  { %v831_v38 = vadd.f32 %v1743_v28, %v798_v36  ;;  %v934_v39 = vadd.f32 %v933_v37, %v687_v19 }
 0x187   :  { %v980_v41 = vmax.f32 %v831_v38, 0.0  ;;  %v965_v42 = vadd.f32 %v1737_v22, %v934_v39  ;;  %v589_v38 = vpop.f32.mrf.mxu1 }
 0x189   :  { %996 = vst [vmem:[#allocation15 + $0x38] sm:$0xff] %v980_v41  ;;  %v1013_v43 = vmax.f32 %v965_v42, 0.0 }
 0x18a   :  { %v800_v44 = vpop.f32.mrf.mxu3 }
 0x18b   :  { %1029 = vst [vmem:[#allocation16 + $0x40] sm:$0xff] %v1013_v43  ;;  %v801_v46 = vadd.f32 %v800_v44, %v574_v27  ;;  %v704_v42 = vpop.f32.mrf.mxu2 }
 0x18c   :  { %v935_v47 = vpop.f32.mrf.mxu0 }
 0x18d   :  { %v832_v48 = vadd.f32 %v1743_v28, %v801_v46  ;;  %v936_v49 = vadd.f32 %v935_v47, %v689_v33 }
 0x18f   :  { %v981_v50 = vmax.f32 %v832_v48, 0.0  ;;  %v966_v51 = vadd.f32 %v1737_v22, %v936_v49  ;;  %v591_v49 = vpop.f32.mrf.mxu1 }
 0x191   :  { %997 = vst [vmem:[#allocation15 + $0x40] sm:$0xff] %v981_v50  ;;  %v1014_v53 = vmax.f32 %v966_v51, 0.0 }
 0x192   :  { %v802_v54 = vpop.f32.mrf.mxu3 }
 0x193   :  { %1030 = vst [vmem:[#allocation16 + $0x48] sm:$0xff] %v1014_v53  ;;  %v803_v55 = vadd.f32 %v802_v54, %v576_v40 }
 0x194   :  { %v938_v56 = vpop.f32.mrf.mxu0 }
 0x195   :  { %v833_v58 = vadd.f32 %v1743_v28, %v803_v55  ;;  %v939_v59 = vadd.f32 %v938_v56, %v692_v45 }
 0x197   :  { %v982_v60 = vmax.f32 %v833_v58, 0.0  ;;  %v967_v61 = vadd.f32 %v1737_v22, %v939_v59 }
 0x199   :  { %998 = vst [vmem:[#allocation15 + $0x48] sm:$0xff] %v982_v60  ;;  %v1015_v62 = vmax.f32 %v967_v61, 0.0 }
 0x19a   :  { %v805_v0 = vpop.f32.mrf.mxu3 }
 0x19b   :  { %1031 = vst [vmem:[#allocation16 + $0x50] sm:$0xff] %v1015_v62  ;;  %v806_v1 = vadd.f32 %v805_v0, %v579_v52 }
 0x19c   :  { %v940_v2 = vpop.f32.mrf.mxu0 }
 0x19d   :  { %v834_v3 = vadd.f32 %v1743_v28, %v806_v1  ;;  %v941_v4 = vadd.f32 %v940_v2, %v694_v57 }
 0x19f   :  { %v983_v6 = vmax.f32 %v834_v3, 0.0  ;;  %v968_v7 = vadd.f32 %v1737_v22, %v941_v4 }
 0x1a1   :  { %999 = vst [vmem:[#allocation15 + $0x50] sm:$0xff] %v983_v6  ;;  %v1016_v8 = vmax.f32 %v968_v7, 0.0 }
 0x1a2   :  { %v807_v9 = vpop.f32.mrf.mxu3 }
 0x1a3   :  { %1032 = vst [vmem:[#allocation16 + $0x58] sm:$0xff] %v1016_v8  ;;  %v808_v10 = vadd.f32 %v807_v9, %v581_v63 }
 0x1a4   :  { %v943_v12 = vpop.f32.mrf.mxu0 }
 0x1a5   :  { %v835_v13 = vadd.f32 %v1743_v28, %v808_v10  ;;  %v944_v14 = vadd.f32 %v943_v12, %v697_v5 }
 0x1a7   :  { %v984_v15 = vmax.f32 %v835_v13, 0.0  ;;  %v969_v16 = vadd.f32 %v1737_v22, %v944_v14 }
 0x1a9   :  { %1000 = vst [vmem:[#allocation15 + $0x58] sm:$0xff] %v984_v15  ;;  %v1017_v18 = vmax.f32 %v969_v16, 0.0 }
 0x1aa   :  { %v810_v19 = vpop.f32.mrf.mxu3 }
 0x1ab   :  { %1033 = vst [vmem:[#allocation16 + $0x60] sm:$0xff] %v1017_v18  ;;  %v811_v20 = vadd.f32 %v810_v19, %v584_v11 }
 0x1ac   :  { %v945_v21 = vpop.f32.mrf.mxu0 }
 0x1ad   :  { %v836_v23 = vadd.f32 %v1743_v28, %v811_v20  ;;  %v946_v24 = vadd.f32 %v945_v21, %v699_v17 }
 0x1af   :  { %v985_v26 = vmax.f32 %v836_v23, 0.0  ;;  %v970_v27 = vadd.f32 %v1737_v22, %v946_v24 }
 0x1b1   :  { %1001 = vst [vmem:[#allocation15 + $0x60] sm:$0xff] %v985_v26  ;;  %v1018_v29 = vmax.f32 %v970_v27, 0.0 }
 0x1b2   :  { %v812_v31 = vpop.f32.mrf.mxu3 }
 0x1b3   :  { %1034 = vst [vmem:[#allocation16 + $0x68] sm:$0xff] %v1018_v29  ;;  %v813_v32 = vadd.f32 %v812_v31, %v586_v25 }
 0x1b4   :  { %v948_v33 = vpop.f32.mrf.mxu0 }
 0x1b5   :  { %v837_v34 = vadd.f32 %v1743_v28, %v813_v32  ;;  %v949_v35 = vadd.f32 %v948_v33, %v702_v30 }
 0x1b7   :  { %v986_v36 = vmax.f32 %v837_v34, 0.0  ;;  %v971_v37 = vadd.f32 %v1737_v22, %v949_v35 }
 0x1b9   :  { %1002 = vst [vmem:[#allocation15 + $0x68] sm:$0xff] %v986_v36  ;;  %v1019_v39 = vmax.f32 %v971_v37, 0.0 }
 0x1ba   :  { %v815_v40 = vpop.f32.mrf.mxu3 }
 0x1bb   :  { %1035 = vst [vmem:[#allocation16 + $0x70] sm:$0xff] %v1019_v39  ;;  %v816_v41 = vadd.f32 %v815_v40, %v589_v38 }
 0x1bc   :  { %v950_v43 = vpop.f32.mrf.mxu0 }
 0x1bd   :  { %v838_v44 = vadd.f32 %v1743_v28, %v816_v41  ;;  %v951_v45 = vadd.f32 %v950_v43, %v704_v42 }
 0x1bf   :  { %v987_v46 = vmax.f32 %v838_v44, 0.0  ;;  %v972_v47 = vadd.f32 %v1737_v22, %v951_v45 }
 0x1c1   :  { %1003 = vst [vmem:[#allocation15 + $0x70] sm:$0xff] %v987_v46  ;;  %v1020_v48 = vmax.f32 %v972_v47, 0.0 }
 0x1c2   :  { %v817_v50 = vpop.f32.mrf.mxu3 }
 0x1c3   :  { %1036 = vst [vmem:[#allocation16 + $0x78] sm:$0xff] %v1020_v48  ;;  %v818_v51 = vadd.f32 %v817_v50, %v591_v49 }
 0x1c4   :  { %1062 = dma.vmem_to_hbm [thread:$0]  %s1055_s7, 2048, %s1057_s27, [#allocation17], %s1635_s12, %s1635_s12, %s1636_s13  }
 0x1c5   :  { %v839_v52 = vadd.f32 %v1743_v28, %v818_v51 }
 0x1c7   :  { %v988_v22 = vmax.f32 %v839_v52, 0.0 }
 0x1c9   :  { %1004 = vst [vmem:[#allocation15 + $0x78] sm:$0xff] %v988_v22 }
 0x1ca   :  { %1049 = dma.vmem_to_hbm [thread:$0]  %s1042_s29, 2048, %s1044_s6, [#allocation5], %s1635_s12, %s1635_s12, %s1636_s13  }
 0x1cb   :  { %1620 = dma.done.wait [#allocation5], 2048  }
 0x1cc   :  { %1621 = vsyncadd [#allocation5], 4294965248 }
 0x1cd   :  { %1622 = dma.done.wait [#allocation17], 2048  }
 0x1ce   :  { %1623 = vsyncadd [#allocation17], 4294965248 }
 0x1cf   :  { %1071 = vsyncpa [#allocation4], 1 }
 0x1d0   :  { %1072 = vsyncpa [#allocation7], 1 }
 0x1d1   :  { %1073 = vsyncpa [#allocation10], 1 }
 0x1d2   :  { %1074 = vsyncpa [#allocation13], 1 }
 0x1d3   :  { %1075 = vsyncpa [#allocation5], 1 }
 0x1d4   :  { %1076 = vsyncpa [#allocation17], 1 }

</bundles_post_ra>
